<compile_context>
chip_gen: v7x
topology: tpu7x:2x2x1
jax: 0.10.0
libtpu: 0.0.40
codegen_flags: <defaults>
</compile_context>

<pallas_src>
import jax
import jax.numpy as jnp
from jax.experimental import pallas as pl
from jax.experimental.pallas import tpu as pltpu

_LANE = 128        # lane width (last-dim padding target)
_SUBLANE = 8       # sublane width (row padding target)
_FUSE_N_MAX = 1024  # all three ranks resident in VMEM below this size -> fused call
_ROW_TILE = 256    # L row-tile for the tiled path (fits v7x 64 MiB VMEM with margin)


def _round_up(a, m):
    return (a + m - 1) // m * m


def _pad_rank(x, w, lap, n_pad, c_pad):
    n, c = x.shape
    xp = jnp.pad(x, ((0, n_pad - n), (0, c_pad - c)))
    wp = jnp.pad(w, ((0, c_pad - c), (0, c_pad - c)))
    lp = jnp.pad(lap, ((0, n_pad - n), (0, n_pad - n)))
    return xp, wp, lp


# ---------------------------------------------------------------------------
# Fused path: one pallas_call computes all three ranks (small complexes).
# ---------------------------------------------------------------------------
def _scn2_fused_kernel(x0, w0, l0, x1, w1, l1, x2, w2, l2, o0, o1, o2):
    for x_ref, w_ref, l_ref, o_ref in (
        (x0, w0, l0, o0),
        (x1, w1, l1, o1),
        (x2, w2, l2, o2),
    ):
        xw = jnp.dot(x_ref[...], w_ref[...], preferred_element_type=jnp.float32)
        y = jnp.dot(l_ref[...], xw, preferred_element_type=jnp.float32)
        # relu on the f32 accumulator, cast only at the store (cheap on all gens).
        o_ref[...] = jnp.maximum(y, 0.0).astype(o_ref.dtype)


def _scn2_fused(xs, ws, laps):
    dims, flat = [], []
    flops = 0
    bytes_acc = 0
    for x, w, lap in zip(xs, ws, laps):
        n, c = x.shape
        n_pad = _round_up(n, _SUBLANE)
        c_pad = _round_up(c, _LANE)
        dims.append((n, c, n_pad, c_pad))
        flat.extend(_pad_rank(x, w, lap, n_pad, c_pad))
        flops += 2 * n_pad * c_pad * c_pad + 2 * n_pad * n_pad * c_pad
        bytes_acc += 4 * (n_pad * n_pad + 3 * n_pad * c_pad + c_pad * c_pad)

    vmem = pl.BlockSpec(memory_space=pltpu.MemorySpace.VMEM)
    outs = pl.pallas_call(
        _scn2_fused_kernel,
        out_shape=tuple(
            jax.ShapeDtypeStruct((n_pad, c_pad), x.dtype)
            for x, (_, _, n_pad, c_pad) in zip(xs, dims)
        ),
        in_specs=[vmem] * 9,
        out_specs=(vmem, vmem, vmem),
        cost_estimate=pl.CostEstimate(
            flops=flops, transcendentals=0, bytes_accessed=bytes_acc
        ),
    )(*flat)
    return tuple(o[:n, :c] for o, (n, c, _, _) in zip(outs, dims))


# ---------------------------------------------------------------------------
# Tiled path: row-tiled over the Laplacian, persistent x@W scratch (large n).
# ---------------------------------------------------------------------------
def _scn_tiled_kernel(x_ref, w_ref, lap_ref, o_ref, xw_ref):
    # xw = x @ W is computed once (step 0) into a VMEM scratch that persists
    # across grid steps; each step then does one L row-tile @ xw on the MXU.
    @pl.when(pl.program_id(0) == 0)
    def _():
        xw_ref[...] = jnp.dot(
            x_ref[...], w_ref[...], preferred_element_type=jnp.float32
        )

    y = jnp.dot(lap_ref[...], xw_ref[...], preferred_element_type=jnp.float32)
    o_ref[...] = jnp.maximum(y, 0.0).astype(o_ref.dtype)


def scn_conv_relu_tiled(x, w, lap, *, tm_target=_ROW_TILE):
    """relu(lap @ (x @ w)) with a row-tiled grid over the Laplacian."""
    n, c = x.shape
    c_pad = _round_up(c, _LANE)
    tm = min(tm_target, _round_up(n, _SUBLANE))
    n_pad = _round_up(n, tm)
    xp, wp, lp = _pad_rank(x, w, lap, n_pad, c_pad)

    flops = 2 * n_pad * c_pad * c_pad + 2 * n_pad * n_pad * c_pad
    bytes_acc = 4 * (n_pad * n_pad + 3 * n_pad * c_pad + c_pad * c_pad)

    out = pl.pallas_call(
        _scn_tiled_kernel,
        out_shape=jax.ShapeDtypeStruct((n_pad, c_pad), x.dtype),
        grid_spec=pltpu.PrefetchScalarGridSpec(
            num_scalar_prefetch=0,
            grid=(n_pad // tm,),
            in_specs=[
                pl.BlockSpec((n_pad, c_pad), lambda i: (0, 0)),  # x   (resident)
                pl.BlockSpec((c_pad, c_pad), lambda i: (0, 0)),  # W   (resident)
                pl.BlockSpec((tm, n_pad), lambda i: (i, 0)),     # L row tile
            ],
            out_specs=pl.BlockSpec((tm, c_pad), lambda i: (i, 0)),
            scratch_shapes=[pltpu.VMEM((n_pad, c_pad), jnp.float32)],
        ),
        # The xw scratch is written only on step 0 and read on later steps, so the
        # row axis must stay "arbitrary" (megacore-sharding it would leave one
        # core's scratch uninitialized).
        compiler_params=pltpu.CompilerParams(dimension_semantics=("arbitrary",)),
        cost_estimate=pl.CostEstimate(
            flops=flops, transcendentals=0, bytes_accessed=bytes_acc
        ),
    )(xp, wp, lp)
    return out[:n, :c]


# ---------------------------------------------------------------------------
# Layer
# ---------------------------------------------------------------------------
@jax.jit
def scn2_forward(w0, w1, w2, x_0, x_1, x_2, lap_0, lap_1, lap_2):
    xs, ws, laps = (x_0, x_1, x_2), (w0, w1, w2), (lap_0, lap_1, lap_2)
    # Static (trace-time) shape-based choice of execution path.
    if max(x.shape[0] for x in xs) <= _FUSE_N_MAX:
        return _scn2_fused(xs, ws, laps)
    return tuple(scn_conv_relu_tiled(x, w, lap) for x, w, lap in zip(xs, ws, laps))


def xavier_uniform(key, shape, gain=1.414):
    # deterministic replacement for torch.nn.init.xavier_uniform_(w, gain=1.414)
    fan_in, fan_out = shape
    limit = gain * jnp.sqrt(6.0 / (fan_in + fan_out))
    return jax.random.uniform(key, shape, jnp.float32, -limit, limit)


class SCN2LayerPallas:
    """Pallas implementation of SCN2Layer forward."""

    def __init__(self, in_channels_0, in_channels_1, in_channels_2, key):
        k0, k1, k2 = jax.random.split(key, 3)
        self.w0 = xavier_uniform(k0, (in_channels_0, in_channels_0))
        self.w1 = xavier_uniform(k1, (in_channels_1, in_channels_1))
        self.w2 = xavier_uniform(k2, (in_channels_2, in_channels_2))

    def __call__(self, x_0, x_1, x_2, laplacian_0, laplacian_1, laplacian_2):
        return scn2_forward(
            self.w0, self.w1, self.w2, x_0, x_1, x_2, laplacian_0, laplacian_1, laplacian_2
        )


if __name__ == "__main__":
    key = jax.random.PRNGKey(0)
    k_params, kx0, kx1, kx2, kl0, kl1, kl2, kxt, klt, kwt = jax.random.split(key, 10)

    # small simplicial complex: 16 nodes, 32 edges, 8 faces
    n_nodes, n_edges, n_faces = 16, 32, 8
    c0, c1, c2 = 4, 8, 6

    x_0 = jax.random.normal(kx0, (n_nodes, c0), jnp.float32)
    x_1 = jax.random.normal(kx1, (n_edges, c1), jnp.float32)
    x_2 = jax.random.normal(kx2, (n_faces, c2), jnp.float32)

    # dense stand-ins for the (symmetric) normalized Hodge Laplacians
    def make_lap(k, n):
        a = jax.random.normal(k, (n, n), jnp.float32) * 0.1
        return 0.5 * (a + a.T)

    laplacian_0 = make_lap(kl0, n_nodes)
    laplacian_1 = make_lap(kl1, n_edges)
    laplacian_2 = make_lap(kl2, n_faces)

    layer = SCN2LayerPallas(c0, c1, c2, k_params)
    y0, y1, y2 = layer(x_0, x_1, x_2, laplacian_0, laplacian_1, laplacian_2)
    jax.block_until_ready((y0, y1, y2))

    # reference check in plain JAX (fused small-complex path)
    r0 = jnp.maximum(laplacian_0 @ (x_0 @ layer.w0), 0.0)
    r1 = jnp.maximum(laplacian_1 @ (x_1 @ layer.w1), 0.0)
    r2 = jnp.maximum(laplacian_2 @ (x_2 @ layer.w2), 0.0)
    assert y0.shape == r0.shape and y1.shape == r1.shape and y2.shape == r2.shape
    assert jnp.allclose(y0, r0, atol=1e-5), "rank-0 mismatch"
    assert jnp.allclose(y1, r1, atol=1e-5), "rank-1 mismatch"
    assert jnp.allclose(y2, r2, atol=1e-5), "rank-2 mismatch"

    # also exercise the row-tiled path directly (padding + grid + persistent scratch)
    n_big, c_big = 384, 12
    x_t = jax.random.normal(kxt, (n_big, c_big), jnp.float32)
    w_t = xavier_uniform(kwt, (c_big, c_big))
    lap_t = make_lap(klt, n_big)
    y_t = scn_conv_relu_tiled(x_t, w_t, lap_t)
    jax.block_until_ready(y_t)
    r_t = jnp.maximum(
        jnp.dot(
            lap_t,
            jnp.dot(x_t, w_t, precision=jax.lax.Precision.HIGHEST),
            precision=jax.lax.Precision.HIGHEST,
        ),
        0.0,
    )
    assert y_t.shape == (n_big, c_big)
    assert jnp.allclose(y_t, r_t, atol=1e-3, rtol=1e-3), "tiled-path mismatch"

    print("KERNEL_OK")
</pallas_src>

<mosaic_0001>
module attributes {stable_mosaic.version = 11 : i64} {
  func.func @_scn2_fused_kernel(%arg0: memref<16x128xf32, #tpu.memory_space<vmem>>, %arg1: memref<128x128xf32, #tpu.memory_space<vmem>>, %arg2: memref<16x16xf32, #tpu.memory_space<vmem>>, %arg3: memref<32x128xf32, #tpu.memory_space<vmem>>, %arg4: memref<128x128xf32, #tpu.memory_space<vmem>>, %arg5: memref<32x32xf32, #tpu.memory_space<vmem>>, %arg6: memref<8x128xf32, #tpu.memory_space<vmem>>, %arg7: memref<128x128xf32, #tpu.memory_space<vmem>>, %arg8: memref<8x8xf32, #tpu.memory_space<vmem>>, %arg9: memref<16x128xf32, #tpu.memory_space<vmem>>, %arg10: memref<32x128xf32, #tpu.memory_space<vmem>>, %arg11: memref<8x128xf32, #tpu.memory_space<vmem>>) attributes {dimension_semantics = [], scalar_prefetch = 0 : i64, scratch_operands = 0 : i64, tpu.core_type = #tpu.core_type<tc>} {
    %c0 = arith.constant 0 : index
    %c0_0 = arith.constant 0 : index
    %0 = vector.load %arg0[%c0, %c0_0] : memref<16x128xf32, #tpu.memory_space<vmem>>, vector<16x128xf32>
    %c0_1 = arith.constant 0 : index
    %c0_2 = arith.constant 0 : index
    %1 = vector.load %arg1[%c0_1, %c0_2] : memref<128x128xf32, #tpu.memory_space<vmem>>, vector<128x128xf32>
    %cst = arith.constant dense<0.000000e+00> : vector<16x128xf32>
    %2 = tpu.matmul %0, %1, %cst {dimension_numbers = #tpu.dot_dimension_numbers<[1], [0], [0], [1], [0, 0, 1, 1], [], []>} : vector<16x128xf32>, vector<128x128xf32>, vector<16x128xf32> -> vector<16x128xf32>
    %c0_3 = arith.constant 0 : index
    %c0_4 = arith.constant 0 : index
    %3 = vector.load %arg2[%c0_3, %c0_4] : memref<16x16xf32, #tpu.memory_space<vmem>>, vector<16x16xf32>
    %cst_5 = arith.constant dense<0.000000e+00> : vector<16x128xf32>
    %4 = tpu.matmul %3, %2, %cst_5 {dimension_numbers = #tpu.dot_dimension_numbers<[1], [0], [0], [1], [0, 0, 1, 1], [], []>} : vector<16x16xf32>, vector<16x128xf32>, vector<16x128xf32> -> vector<16x128xf32>
    %cst_6 = arith.constant 0.000000e+00 : f32
    %5 = vector.broadcast %cst_6 : f32 to vector<16x128xf32>
    %6 = arith.maximumf %4, %5 : vector<16x128xf32>
    %c0_7 = arith.constant 0 : index
    %c0_8 = arith.constant 0 : index
    %7 = vector.load %arg9[%c0_7, %c0_8] : memref<16x128xf32, #tpu.memory_space<vmem>>, vector<16x128xf32>
    tpu.vector_store %arg9[%c0_7, %c0_8], %6 {strides = array<i32>} : memref<16x128xf32, #tpu.memory_space<vmem>>, vector<16x128xf32>,
    %c0_9 = arith.constant 0 : index
    %c0_10 = arith.constant 0 : index
    %8 = vector.load %arg3[%c0_9, %c0_10] : memref<32x128xf32, #tpu.memory_space<vmem>>, vector<32x128xf32>
    %c0_11 = arith.constant 0 : index
    %c0_12 = arith.constant 0 : index
    %9 = vector.load %arg4[%c0_11, %c0_12] : memref<128x128xf32, #tpu.memory_space<vmem>>, vector<128x128xf32>
    %cst_13 = arith.constant dense<0.000000e+00> : vector<32x128xf32>
    %10 = tpu.matmul %8, %9, %cst_13 {dimension_numbers = #tpu.dot_dimension_numbers<[1], [0], [0], [1], [0, 0, 1, 1], [], []>} : vector<32x128xf32>, vector<128x128xf32>, vector<32x128xf32> -> vector<32x128xf32>
    %c0_14 = arith.constant 0 : index
    %c0_15 = arith.constant 0 : index
    %11 = vector.load %arg5[%c0_14, %c0_15] : memref<32x32xf32, #tpu.memory_space<vmem>>, vector<32x32xf32>
    %cst_16 = arith.constant dense<0.000000e+00> : vector<32x128xf32>
    %12 = tpu.matmul %11, %10, %cst_16 {dimension_numbers = #tpu.dot_dimension_numbers<[1], [0], [0], [1], [0, 0, 1, 1], [], []>} : vector<32x32xf32>, vector<32x128xf32>, vector<32x128xf32> -> vector<32x128xf32>
    %cst_17 = arith.constant 0.000000e+00 : f32
    %13 = vector.broadcast %cst_17 : f32 to vector<32x128xf32>
    %14 = arith.maximumf %12, %13 : vector<32x128xf32>
    %c0_18 = arith.constant 0 : index
    %c0_19 = arith.constant 0 : index
    %15 = vector.load %arg10[%c0_18, %c0_19] : memref<32x128xf32, #tpu.memory_space<vmem>>, vector<32x128xf32>
    tpu.vector_store %arg10[%c0_18, %c0_19], %14 {strides = array<i32>} : memref<32x128xf32, #tpu.memory_space<vmem>>, vector<32x128xf32>,
    %c0_20 = arith.constant 0 : index
    %c0_21 = arith.constant 0 : index
    %16 = vector.load %arg6[%c0_20, %c0_21] : memref<8x128xf32, #tpu.memory_space<vmem>>, vector<8x128xf32>
    %c0_22 = arith.constant 0 : index
    %c0_23 = arith.constant 0 : index
    %17 = vector.load %arg7[%c0_22, %c0_23] : memref<128x128xf32, #tpu.memory_space<vmem>>, vector<128x128xf32>
    %cst_24 = arith.constant dense<0.000000e+00> : vector<8x128xf32>
    %18 = tpu.matmul %16, %17, %cst_24 {dimension_numbers = #tpu.dot_dimension_numbers<[1], [0], [0], [1], [0, 0, 1, 1], [], []>} : vector<8x128xf32>, vector<128x128xf32>, vector<8x128xf32> -> vector<8x128xf32>
    %c0_25 = arith.constant 0 : index
    %c0_26 = arith.constant 0 : index
    %19 = vector.load %arg8[%c0_25, %c0_26] : memref<8x8xf32, #tpu.memory_space<vmem>>, vector<8x8xf32>
    %cst_27 = arith.constant dense<0.000000e+00> : vector<8x128xf32>
    %20 = tpu.matmul %19, %18, %cst_27 {dimension_numbers = #tpu.dot_dimension_numbers<[1], [0], [0], [1], [0, 0, 1, 1], [], []>} : vector<8x8xf32>, vector<8x128xf32>, vector<8x128xf32> -> vector<8x128xf32>
    %cst_28 = arith.constant 0.000000e+00 : f32
    %21 = vector.broadcast %cst_28 : f32 to vector<8x128xf32>
    %22 = arith.maximumf %20, %21 : vector<8x128xf32>
    %c0_29 = arith.constant 0 : index
    %c0_30 = arith.constant 0 : index
    %23 = vector.load %arg11[%c0_29, %c0_30] : memref<8x128xf32, #tpu.memory_space<vmem>>, vector<8x128xf32>
    tpu.vector_store %arg11[%c0_29, %c0_30], %22 {strides = array<i32>} : memref<8x128xf32, #tpu.memory_space<vmem>>, vector<8x128xf32>,
    return
  }
}

</mosaic_0001>

<bundles_post_ra>
// kernel: scn2_forward.1
= control target key start
LH: loop header
LB: loop body
LE: loop exit
PB: predicated region body
PF: predicated region fallthrough
CT: control target
= control target key end

     0   :  { %s1240_s0 = inlined_call_operand.vmem [shape: f32[16,128], index: 0, kind: input, shape index: {}]   ;;  %s1241_s1 = inlined_call_operand.vmem [shape: f32[128,128], index: 1, kind: input, shape index: {}]   ;;  %s1242_s2 = inlined_call_operand.vmem [shape: f32[16,16], index: 2, kind: input, shape index: {}]   ;;  %s1243_s3 = inlined_call_operand.vmem [shape: f32[32,128], index: 3, kind: input, shape index: {}]   ;;  %s1244_s4 = inlined_call_operand.vmem [shape: f32[128,128], index: 4, kind: input, shape index: {}]   ;;  %s1245_s5 = inlined_call_operand.vmem [shape: f32[32,32], index: 5, kind: input, shape index: {}]   ;;  %s1246_s6 = inlined_call_operand.vmem [shape: f32[8,128], index: 6, kind: input, shape index: {}]   ;;  %s1247_s7 = inlined_call_operand.vmem [shape: f32[128,128], index: 7, kind: input, shape index: {}]   ;;  %s1248_s8 = inlined_call_operand.vmem [shape: f32[8,8], index: 8, kind: input, shape index: {}]   ;;  %s1249_s9 = inlined_call_operand.vmem [shape: f32[16,128], index: 9, kind: output, shape index: {0}]   ;;  %s1250_s10 = inlined_call_operand.vmem [shape: f32[32,128], index: 10, kind: output, shape index: {1}]   ;;  %s1251_s11 = inlined_call_operand.hbm [shape: f32[8,128], index: 11, kind: output, shape index: {2}]  }
   0x1   :  { %v38_v0 = vld [vmem:[%s1241_s1] sm:$0xff]  ;;  %v39_v1 = vld [vmem:[%s1241_s1 + $0x8] sm:$0xff]  ;;  %v40_v5 = vld [vmem:[%s1241_s1 + $0x10] sm:$0xff] }
   0x2   :  { %v221_v2 = vld [vmem:[%s1244_s4] sm:$0xff]  ;;  %v828_v3 = vpack.c.bf16 %v39_v1, %v38_v0  ;;  %v222_v4 = vld [vmem:[%s1244_s4 + $0x8] sm:$0xff]  ;;  %v41_v6 = vld [vmem:[%s1241_s1 + $0x18] sm:$0xff] }
   0x3   :  { %v864_v7 = vpack.c.bf16 %v222_v4, %v221_v2  ;;  %v832_v8 = vpack.c.bf16 %v41_v6, %v40_v5  ;;  %v223_v9 = vld [vmem:[%s1244_s4 + $0x10] sm:$0xff]  ;;  %v224_v10 = vld [vmem:[%s1244_s4 + $0x18] sm:$0xff]  ;;  %v42_v11 = vld [vmem:[%s1241_s1 + $0x20] sm:$0xff] }
   0x4   :  { %829 = vmatprep.subr.bf16.mxu0 %v828_v3  ;;  %v868_v12 = vpack.c.bf16 %v224_v10, %v223_v9  ;;  %v43_v13 = vld [vmem:[%s1241_s1 + $0x28] sm:$0xff]  ;;  %v225_v14 = vld [vmem:[%s1244_s4 + $0x20] sm:$0xff]  ;;  %v44_v18 = vld [vmem:[%s1241_s1 + $0x30] sm:$0xff] }
   0x5   :  { %v226_v15 = vld [vmem:[%s1244_s4 + $0x28] sm:$0xff]  ;;  %865 = vmatprep.subr.bf16.mxu1 %v864_v7  ;;  %831 = vmatpush3.bf16.msra.mxu0 %v828_v3  ;;  %v836_v16 = vpack.c.bf16 %v43_v13, %v42_v11  ;;  %v45_v19 = vld [vmem:[%s1241_s1 + $0x38] sm:$0xff]  ;;  %v227_v20 = vld [vmem:[%s1244_s4 + $0x30] sm:$0xff] }
   0x6   :  { %867 = vmatpush3.bf16.msra.mxu1 %v864_v7  ;;  %833 = vmatprep.subr.bf16.mxu0 %v832_v8  ;;  %v872_v17 = vpack.c.bf16 %v226_v15, %v225_v14  ;;  %v228_v21 = vld [vmem:[%s1244_s4 + $0x38] sm:$0xff]  ;;  %v840_v22 = vpack.c.bf16 %v45_v19, %v44_v18  ;;  %v46_v24 = vld [vmem:[%s1241_s1 + $0x40] sm:$0xff]  ;;  %v47_v25 = vld [vmem:[%s1241_s1 + $0x48] sm:$0xff] }
   0x7   :  { %869 = vmatprep.subr.bf16.mxu1 %v868_v12  ;;  %v876_v23 = vpack.c.bf16 %v228_v21, %v227_v20  ;;  %v36_v26 = vld [vmem:[%s1240_s0] sm:$0xff]  ;;  %v230_v28 = vld [vmem:[%s1244_s4 + $0x48] sm:$0xff]  ;;  %v844_v30 = vpack.c.bf16 %v47_v25, %v46_v24  ;;  %v48_v32 = vld [vmem:[%s1241_s1 + $0x50] sm:$0xff] }
   0x8   :  { %v229_v27 = vld [vmem:[%s1244_s4 + $0x40] sm:$0xff]  ;;  %726 = vmatprep.mubr.f32.mxu0 %v36_v26  ;;  %v49_v33 = vld [vmem:[%s1241_s1 + $0x58] sm:$0xff]  ;;  %v231_v34 = vld [vmem:[%s1244_s4 + $0x50] sm:$0xff] }
   0x9   :  { %835 = vmatpush3.bf16.msra.mxu0 %v832_v8  ;;  %v217_v29 = vld [vmem:[%s1243_s3] sm:$0xff]  ;;  %v880_v31 = vpack.c.bf16 %v230_v28, %v229_v27  ;;  %v232_v35 = vld [vmem:[%s1244_s4 + $0x58] sm:$0xff]  ;;  %v848_v36 = vpack.c.bf16 %v49_v33, %v48_v32  ;;  %v51_v39 = vld [vmem:[%s1241_s1 + $0x68] sm:$0xff] }
   0xa   :  { %871 = vmatpush3.bf16.msra.mxu1 %v868_v12  ;;  %837 = vmatprep.subr.bf16.mxu0 %v836_v16  ;;  %v884_v37 = vpack.c.bf16 %v232_v35, %v231_v34  ;;  %v50_v38 = vld [vmem:[%s1241_s1 + $0x60] sm:$0xff] }
   0xb   :  { %873 = vmatprep.subr.bf16.mxu1 %v872_v17  ;;  %768 = vmatprep.mubr.f32.mxu1 %v217_v29 }
   0xd   :  { %839 = vmatpush3.bf16.msra.mxu0 %v836_v16 }
   0xe   :  { %875 = vmatpush3.bf16.msra.mxu1 %v872_v17  ;;  %841 = vmatprep.subr.bf16.mxu0 %v840_v22 }
   0xf   :  { %877 = vmatprep.subr.bf16.mxu1 %v876_v23 }
  0x11   :  { %843 = vmatpush3.bf16.msra.mxu0 %v840_v22 }
  0x12   :  { %879 = vmatpush3.bf16.msra.mxu1 %v876_v23  ;;  %845 = vmatprep.subr.bf16.mxu0 %v844_v30 }
  0x13   :  { %881 = vmatprep.subr.bf16.mxu1 %v880_v31 }
  0x14   :  { %17 = vsyncpa [#allocation3], 0  ;;  %v233_v40 = vld [vmem:[%s1244_s4 + $0x60] sm:$0xff]  ;;  %v234_v41 = vld [vmem:[%s1244_s4 + $0x68] sm:$0xff]  ;;  %v852_v42 = vpack.c.bf16 %v51_v39, %v50_v38  ;;  %v956_v55 = vmov 0.0|0.0   ;;  %vm957_vm0 = vmmov 0  }
  0x15   :  { %847 = vmatpush3.bf16.msra.mxu0 %v844_v30  ;;  %v888_v43 = vpack.c.bf16 %v234_v41, %v233_v40  ;;  %v52_v44 = vld [vmem:[%s1241_s1 + $0x70] sm:$0xff]  ;;  %v53_v45 = vld [vmem:[%s1241_s1 + $0x78] sm:$0xff]  ;;  %v433_v50 = vld [vmem:[%s1247_s7] sm:$0xff]  ;;  %v958_v0 = vmov 0.0   ;;  %vm131_vm1 = vcmask 130048   ;;  %vm326_vm2 = vcmask 261120  }
  0x16   :  { %883 = vmatpush3.bf16.msra.mxu1 %v880_v31  ;;  %849 = vmatprep.subr.bf16.mxu0 %v848_v36  ;;  %v235_v46 = vld [vmem:[%s1244_s4 + $0x70] sm:$0xff]  ;;  %v236_v47 = vld [vmem:[%s1244_s4 + $0x78] sm:$0xff]  ;;  %v856_v48 = vpack.c.bf16 %v53_v45, %v52_v44  ;;  %v434_v51 = vld [vmem:[%s1247_s7 + $0x8] sm:$0xff]  ;;  %vm520_vm3 = vcmask 64512   ;;  %s959_s22 = smov [#allocation2]  }
  0x17   :  { %885 = vmatprep.subr.bf16.mxu1 %v884_v37  ;;  %v892_v49 = vpack.c.bf16 %v236_v47, %v235_v46  ;;  %v37_v52 = vld [vmem:[%s1240_s0 + $0x8] sm:$0xff]  ;;  %v905_v54 = vpack.c.bf16 %v434_v51, %v433_v50  ;;  %v435_v56 = vld [vmem:[%s1247_s7 + $0x10] sm:$0xff]  ;;  %v436_v57 = vld [vmem:[%s1247_s7 + $0x18] sm:$0xff]  ;;  %s606_s23 = sshll.u32 %s959_s22, 4  ;;  %s607_s23 = int_to_ptr.vmem [resolvable:$true] %s606_s23 }
  0x18   :  { %v218_v53 = vld [vmem:[%s1243_s3 + $0x8] sm:$0xff]  ;;  %v219_v58 = vld [vmem:[%s1243_s3 + $0x10] sm:$0xff]  ;;  %v908_v59 = vpack.c.bf16 %v436_v57, %v435_v56  ;;  %v220_v60 = vld [vmem:[%s1243_s3 + $0x18] sm:$0xff]  ;;  %s932_s24 = scalar_lea.vmem %s607_s23, 128  ;;  %p937_p1 = scmp.lt.s32.totalorder %s607_s23, %s607_s23 }
  0x19   :  { %851 = vmatpush3.bf16.msra.mxu0 %v848_v36  ;;  %v437_v61 = vld [vmem:[%s1247_s7 + $0x20] sm:$0xff]  ;;  %v438_v62 = vld [vmem:[%s1247_s7 + $0x28] sm:$0xff]  ;;  %v439_v1 = vld [vmem:[%s1247_s7 + $0x30] sm:$0xff]  ;;  %p933_p0 = scmp.ne.s32.totalorder %s607_s23, %s932_s24  ;;  %p938_p2 = scmp.lt.s32.totalorder %s932_s24, %s932_s24 }
  0x1a   :  { %887 = vmatpush3.bf16.msra.mxu1 %v884_v37  ;;  %853 = vmatprep.subr.bf16.mxu0 %v852_v42  ;;  %v911_v63 = vpack.c.bf16 %v438_v62, %v437_v61  ;;  %v440_v2 = vld [vmem:[%s1247_s7 + $0x38] sm:$0xff]  ;;  %v441_v4 = vld [vmem:[%s1247_s7 + $0x40] sm:$0xff]  ;;  %v442_v5 = vld [vmem:[%s1247_s7 + $0x48] sm:$0xff] }
  0x1b   :  { %889 = vmatprep.subr.bf16.mxu1 %v888_v43  ;;  %v914_v3 = vpack.c.bf16 %v440_v2, %v439_v1  ;;  %v917_v6 = vpack.c.bf16 %v442_v5, %v441_v4  ;;  %v443_v7 = vld [vmem:[%s1247_s7 + $0x50] sm:$0xff]  ;;  %v444_v8 = vld [vmem:[%s1247_s7 + $0x58] sm:$0xff]  ;;  %v445_v10 = vld [vmem:[%s1247_s7 + $0x60] sm:$0xff]  ;;  %p939_p3 = por %p938_p2, %p937_p1 }
  0x1c   :  { %v920_v9 = vpack.c.bf16 %v444_v8, %v443_v7  ;;  %v446_v11 = vld [vmem:[%s1247_s7 + $0x68] sm:$0xff]  ;;  %v447_v13 = vld [vmem:[%s1247_s7 + $0x70] sm:$0xff]  ;;  %v448_v14 = vld [vmem:[%s1247_s7 + $0x78] sm:$0xff] }
  0x1d   :  { %855 = vmatpush3.bf16.msra.mxu0 %v852_v42  ;;  %v923_v12 = vpack.c.bf16 %v446_v11, %v445_v10  ;;  %v926_v15 = vpack.c.bf16 %v448_v14, %v447_v13  ;;  %v432_v16 = vld [vmem:[%s1246_s6] sm:$0xff]  ;;  %v130_v24 = vld [vmem:[%s1242_s2 + $0x8] sm:$0xff]  ;;  %v324_v30 = vld [vmem:[%s1245_s5 + $0x10] sm:$0xff]  ;;  %p940_p4 = pnand %p939_p3, %p933_p0 }
  0x1e   :  { %891 = vmatpush3.bf16.msra.mxu1 %v888_v43  ;;  %857 = vmatprep.subr.bf16.mxu0 %v856_v48  ;;  %v129_v17 = vld [vmem:[%s1242_s2] sm:$0xff]  ;;  %v323_v29 = vld [vmem:[%s1245_s5 + $0x8] sm:$0xff]  ;;  %v325_v31 = vld [vmem:[%s1245_s5 + $0x18] sm:$0xff] }
  0x1f   :  { %893 = vmatprep.subr.bf16.mxu1 %v892_v49  ;;  %v322_v27 = vld [vmem:[%s1245_s5] sm:$0xff] }
  0x20   :  { %v519_v32 = vld [vmem:[%s1248_s8] sm:$0xff] }
  0x21   :  { %859 = vmatpush3.bf16.msra.mxu0 %v856_v48 }
  0x22   :  { %895 = vmatpush3.bf16.msra.mxu1 %v892_v49 }
  0x23   :  { %904 = vmatprep.subr.bf16.mxu1 %v956_v55 }
  0x24   :  { %727 = vmatmul.mubr.f32.vlgmr.msra.gmra.mrb[0].mxu0 %v37_v52 }
  0x25   :  { %769 = vmatmul.mubr.f32.vlgmr.msra.gmra.mrb[0].mxu1 %v218_v53  ;;  %733 = vmatprep.mubr.msk.f32.mxu0 %vm131_vm1, %v129_v17 }
  0x26   :  { %906 = vmatpush3.bf16.msra.mxu1 %v905_v54  ;;  %771 = vmatprep.mubr.f32.mxu1 %v219_v58 }
  0x27   :  { %907 = vmatprep.subr.bf16.mxu1 %v956_v55 }
  0x29   :  { %772 = vmatmul.mubr.f32.gmra.mrb[2].mxu1 %v220_v60 }
  0x2a   :  { %909 = vmatpush3.bf16.msra.mxu1 %v908_v59  ;;  %820 = vmatprep.mubr.msk.f32.mxu1 %vm957_vm0, %v958_v0 }
  0x2b   :  { %910 = vmatprep.subr.bf16.mxu1 %v956_v55 }
  0x2e   :  { %912 = vmatpush3.bf16.msra.mxu1 %v911_v63 }
  0x2f   :  { %913 = vmatprep.subr.bf16.mxu1 %v956_v55 }
  0x32   :  { %915 = vmatpush3.bf16.msra.mxu1 %v914_v3 }
  0x33   :  { %916 = vmatprep.subr.bf16.mxu1 %v956_v55 }
  0x36   :  { %918 = vmatpush3.bf16.msra.mxu1 %v917_v6 }
  0x37   :  { %919 = vmatprep.subr.bf16.mxu1 %v956_v55 }
  0x3a   :  { %921 = vmatpush3.bf16.msra.mxu1 %v920_v9 }
  0x3b   :  { %922 = vmatprep.subr.bf16.mxu1 %v956_v55 }
  0x3e   :  { %924 = vmatpush3.bf16.msra.mxu1 %v923_v12 }
  0x3f   :  { %925 = vmatprep.subr.bf16.mxu1 %v956_v55 }
  0x42   :  { %927 = vmatpush3.bf16.msra.mxu1 %v926_v15 }
  0x45   :  { %821 = vmatmul.mubr.f32.vlgmr.msra.gmra.mrb[4].mxu1 %v432_v16 }
  0xf7   :  { %v728_v18 = vpop.f32.mrb[0].mxu0 }
  0xf8   :  { %v770_v19 = vpop.f32.mrb[0].mxu1  ;;  %v120_v20 = vpop.f32.mrb[1].mxu0 }
  0xf9   :  { %v860_v21 = vpack.c.bf16 %v728_v18, %v120_v20  ;;  %v303_v22 = vpop.f32.mrb[1].mxu1 }
  0xfa   :  { %v896_v23 = vpack.c.bf16 %v770_v19, %v303_v22 }
  0xfb   :  { %861 = vmatprep.subr.bf16.mxu0 %v860_v21 }
  0xfc   :  { %863 = vmatpush3.bf16.msra.mxu0 %v860_v21  ;;  %v773_v25 = vpop.f32.mrb[2].mxu1 }
  0xfd   :  { %897 = vmatprep.subr.bf16.mxu0 %v896_v23  ;;  %v313_v26 = vpop.f32.mrb[3].mxu1 }
  0xfe   :  { %v900_v28 = vpack.c.bf16 %v773_v25, %v313_v26 }
  0xff   :  { %734 = vmatmul.mubr.msk.f32.vlgmr.msra.gmra.mrb[2].mxu0 %vm131_vm1, %v130_v24 }
 0x100   :  { %899 = vmatpush3.bf16.msra.mxu0 %v896_v23  ;;  %782 = vmatprep.mubr.msk.f32.mxu0 %vm326_vm2, %v322_v27 }
 0x101   :  { %901 = vmatprep.subr.bf16.mxu0 %v900_v28 }
 0x104   :  { %903 = vmatpush3.bf16.msra.mxu0 %v900_v28 }
 0x105   :  { %823 = vmatprep.subr.mxu0 %v958_v0 }
 0x107   :  { %783 = vmatmul.mubr.msk.f32.vlgmr.msra.gmra.mrb[4].mxu0 %vm326_vm2, %v323_v29 }
 0x108   :  { %785 = vmatprep.mubr.msk.f32.mxu0 %vm326_vm2, %v324_v30 }
 0x10b   :  { %786 = vmatmul.mubr.msk.f32.gmra.mrb[6].mxu0 %vm326_vm2, %v325_v31 }
 0x10c   :  { %825 = vmatprep.mubr.msk.f32.mxu0 %vm957_vm0, %v958_v0 }
 0x118   :  { %v515_v33 = vpop.f32.mrb[4].mxu1 }
 0x119   :  { %v822_v34 = vpop.f32.mrb[5].mxu1  ;;  %824 = vmatpush3.msra.mxu0 %v515_v33 }
 0x11a   :  { %826 = vmatmul.mubr.msk.f32.vlgmr.msra.gmra.mrb[8].mxu0 %vm520_vm3, %v519_v32 }
 0x1d2   :  { %v735_v35 = vpop.f32.mrb[2].mxu0 }
 0x1d3   :  { %v214_v36 = vmax.f32 %v735_v35, 0.0  ;;  %v204_v37 = vpop.f32.mrb[3].mxu0 }
 0x1d4   :  { %v213_v38 = vmax.f32 %v204_v37, 0.0 }
 0x1d5   :  { %216 = vst [vmem:[%s1249_s9 + $0x8] sm:$0xff] %v214_v36 }
 0x1d6   :  { %215 = vst [vmem:[%s1249_s9] sm:$0xff] %v213_v38 }
 0x1da   :  { %v784_v39 = vpop.f32.mrb[4].mxu0 }
 0x1db   :  { %v425_v40 = vmax.f32 %v784_v39, 0.0  ;;  %v405_v41 = vpop.f32.mrb[5].mxu0 }
 0x1dc   :  { %v424_v42 = vmax.f32 %v405_v41, 0.0 }
 0x1dd   :  { %429 = vst [vmem:[%s1250_s10 + $0x8] sm:$0xff] %v425_v40 }
 0x1de   :  { %428 = vst [vmem:[%s1250_s10] sm:$0xff] %v424_v42  ;;  %v787_v43 = vpop.f32.mrb[6].mxu0 }
 0x1df   :  { %v427_v44 = vmax.f32 %v787_v43, 0.0  ;;  %v415_v45 = vpop.f32.mrb[7].mxu0 }
 0x1e0   :  { %v426_v46 = vmax.f32 %v415_v45, 0.0 }
 0x1e1   :  { %431 = vst [vmem:[%s1250_s10 + $0x18] sm:$0xff] %v427_v44 }
 0x1e2   :  { %430 = vst [vmem:[%s1250_s10 + $0x10] sm:$0xff] %v426_v46 }
 0x1ed   :  { %v590_v47 = vpop.f32.mrb[8].mxu0 }
 0x1ee   :  { %v594_v48 = vmax.f32 %v590_v47, 0.0  ;;  %v827_v49 = vpop.f32.mrb[9].mxu0 }
 0x1f0   :  { %595 = vst [vmem:[#allocation2] sm:$0xff] %v594_v48 }
 0x1f1   :  { %943 = shalt.err (!%p940_p4)
}
 0x1f2   :  { %s944_s7 = scalar_lea.hbm %s1251_s11, 128 }
 0x1f3   :  { %p945_p5 = scmp.ne.s32.totalorder %s1251_s11, %s944_s7  ;;  %p948_p6 = scmp.lt.u32.totalorder %s944_s7, %s1251_s11 }
 0x1f5   :  { %p950_p7 = pnand %p948_p6, %p945_p5 }
 0x1f7   :  { %953 = shalt.err (!%p950_p7)
}
 0x1f8   :  { %609 = dma.vmem_to_hbm [thread:$0]  %s607_s23, 128, %s1251_s11, [#allocation3]  }
 0x1f9   :  { %954 = dma.done.wait [#allocation3], 128  }
 0x1fa   :  { %955 = vsyncadd [#allocation3], 4294967168 }
 0x1fb   :  { %617 = vsyncpa [#allocation3], 1 }

</bundles_post_ra>
